<compile_context>
chip_gen: v6e
topology: v6e:2x2x1
jax: 0.10.0
libtpu: 0.0.40
codegen_flags: <defaults>
</compile_context>

<pallas_src>
import functools

import jax
import jax.numpy as jnp
from jax.experimental import pallas as pl
from jax.experimental.pallas import tpu as pltpu


def gcn_kernel(a_ref, x_ref, w1_ref, b1_ref, w2_ref, b2_ref, u_ref, o_ref,
               *, num_classes, keep_prob):
    # ---- layer 1: A_hat @ (X @ W1) + b1, ReLU (bf16 MXU operands, f32 acc) ----
    xw = jnp.dot(x_ref[...], w1_ref[...], preferred_element_type=jnp.float32)
    h = jnp.dot(a_ref[...], xw.astype(jnp.bfloat16),
                preferred_element_type=jnp.float32) + b1_ref[...]
    h = jnp.maximum(h, 0.0)

    # ---- dropout p = 1 - keep_prob (training-mode semantics of F.dropout) ----
    keep = u_ref[...] < keep_prob
    h = jnp.where(keep, h * (1.0 / keep_prob), 0.0)

    # ---- layer 2: A_hat @ (H @ W2) + b2 ----
    hw = jnp.dot(h.astype(jnp.bfloat16), w2_ref[...],
                 preferred_element_type=jnp.float32)
    z = jnp.dot(a_ref[...], hw.astype(jnp.bfloat16),
                preferred_element_type=jnp.float32) + b2_ref[...]

    # ---- log_softmax over dim=1 (mask padded class lanes with -inf) ----
    lane = jax.lax.broadcasted_iota(jnp.int32, z.shape, 1)
    z = jnp.where(lane < num_classes, z, -jnp.inf)
    m = jnp.max(z, axis=1, keepdims=True)
    lse = jnp.log(jnp.sum(jnp.exp(z - m), axis=1, keepdims=True)) + m
    o_ref[...] = z - lse            # lane-dense store; wrapper slices real lanes


def _pad2d(x, rows, cols):
    return jnp.pad(x, ((0, rows - x.shape[0]), (0, cols - x.shape[1])))


def gcn_forward(a_hat, x, w1, b1, w2, b2, dropout_key, *, p=0.2):
    n, f = x.shape
    hidden = w1.shape[1]
    num_classes = w2.shape[1]

    # lane-align everything to 128 in the wrapper (zero padding is exact for
    # the contractions; padded class lanes are masked inside the kernel).
    fp = ((f + 127) // 128) * 128
    hp = ((hidden + 127) // 128) * 128
    cp = ((num_classes + 127) // 128) * 128

    x_p = _pad2d(x, n, fp).astype(jnp.bfloat16)
    w1_p = _pad2d(w1, fp, hp).astype(jnp.bfloat16)
    b1_p = jnp.pad(b1, (0, hp - hidden)).reshape(1, hp).astype(jnp.float32)
    w2_p = _pad2d(w2, hp, cp).astype(jnp.bfloat16)
    b2_p = jnp.pad(b2, (0, cp - num_classes)).reshape(1, cp).astype(jnp.float32)
    a_bf = a_hat.astype(jnp.bfloat16)

    # deterministic dropout uniforms (kernel keeps where u < 1-p)
    u = jax.random.uniform(dropout_key, (n, hp), jnp.float32)

    vmem = pl.BlockSpec(memory_space=pltpu.MemorySpace.VMEM)
    kernel = functools.partial(gcn_kernel, num_classes=num_classes,
                               keep_prob=1.0 - p)
    out = pl.pallas_call(
        kernel,
        out_shape=jax.ShapeDtypeStruct((n, cp), jnp.float32),
        in_specs=[vmem] * 7,
        out_specs=vmem,
    )(a_bf, x_p, w1_p, b1_p, w2_p, b2_p, u)
    return out[:, :num_classes]


def build_normalized_adjacency(edge_index, num_nodes):
    rows, cols = edge_index
    a = jnp.zeros((num_nodes, num_nodes), jnp.float32)
    a = a.at[rows, cols].set(1.0)
    eye = jnp.eye(num_nodes, dtype=jnp.float32)
    a = jnp.where(eye > 0, 1.0, a)                 # self-loops (idempotent)
    deg = jnp.sum(a, axis=1)
    d_inv_sqrt = jnp.where(deg > 0, 1.0 / jnp.sqrt(deg), 0.0)
    return a * d_inv_sqrt[:, None] * d_inv_sqrt[None, :]


def glorot(key, shape):
    fan_in, fan_out = shape
    limit = jnp.sqrt(6.0 / (fan_in + fan_out))
    return jax.random.uniform(key, shape, jnp.float32, -limit, limit)


if __name__ == "__main__":
    num_nodes = 16
    num_features = 100   # matches the module's `num_features`
    hidden = 32
    num_classes = 2

    key = jax.random.PRNGKey(0)
    k_x, k_w1, k_w2, k_drop = jax.random.split(key, 4)

    # deterministic node features (the module's global `X`)
    X = jax.random.normal(k_x, (num_nodes, num_features), jnp.float32)

    # deterministic synthetic edge_index (ring graph, both directions)
    rows = list(range(num_nodes)) + [(i + 1) % num_nodes for i in range(num_nodes)]
    cols = [(i + 1) % num_nodes for i in range(num_nodes)] + list(range(num_nodes))
    edge_index = (jnp.array(rows, jnp.int32), jnp.array(cols, jnp.int32))
    a_hat = build_normalized_adjacency(edge_index, num_nodes)

    # deterministic parameters (GCNConv weight [in, out], bias [out])
    w1 = glorot(k_w1, (num_features, hidden))
    b1 = jnp.zeros((hidden,), jnp.float32)
    w2 = glorot(k_w2, (hidden, num_classes))
    b2 = jnp.zeros((num_classes,), jnp.float32)

    out = gcn_forward(a_hat, X, w1, b1, w2, b2, k_drop, p=0.2)
    out = jax.block_until_ready(out)
    assert out.shape == (num_nodes, num_classes)
    assert bool(jnp.all(jnp.isfinite(out)))
    print("KERNEL_OK")
</pallas_src>

<mosaic_0001>
module attributes {stable_mosaic.version = 11 : i64} {
  func.func @gcn_kernel(%arg0: memref<16x16xbf16, #tpu.memory_space<vmem>>, %arg1: memref<16x128xbf16, #tpu.memory_space<vmem>>, %arg2: memref<128x128xbf16, #tpu.memory_space<vmem>>, %arg3: memref<1x128xf32, #tpu.memory_space<vmem>>, %arg4: memref<128x128xbf16, #tpu.memory_space<vmem>>, %arg5: memref<1x128xf32, #tpu.memory_space<vmem>>, %arg6: memref<16x128xf32, #tpu.memory_space<vmem>>, %arg7: memref<16x128xf32, #tpu.memory_space<vmem>>) attributes {dimension_semantics = [], scalar_prefetch = 0 : i64, scratch_operands = 0 : i64, tpu.core_type = #tpu.core_type<tc>} {
    %c0 = arith.constant 0 : index
    %c0_0 = arith.constant 0 : index
    %0 = vector.load %arg1[%c0, %c0_0] : memref<16x128xbf16, #tpu.memory_space<vmem>>, vector<16x128xbf16>
    %c0_1 = arith.constant 0 : index
    %c0_2 = arith.constant 0 : index
    %1 = vector.load %arg2[%c0_1, %c0_2] : memref<128x128xbf16, #tpu.memory_space<vmem>>, vector<128x128xbf16>
    %cst = arith.constant dense<0.000000e+00> : vector<16x128xf32>
    %2 = tpu.matmul %0, %1, %cst {dimension_numbers = #tpu.dot_dimension_numbers<[1], [0], [0], [1], [0, 0, 1, 1], [], []>} : vector<16x128xbf16>, vector<128x128xbf16>, vector<16x128xf32> -> vector<16x128xf32>
    %c0_3 = arith.constant 0 : index
    %c0_4 = arith.constant 0 : index
    %3 = vector.load %arg0[%c0_3, %c0_4] : memref<16x16xbf16, #tpu.memory_space<vmem>>, vector<16x16xbf16>
    %4 = arith.truncf %2 : vector<16x128xf32> to vector<16x128xbf16>
    %cst_5 = arith.constant dense<0.000000e+00> : vector<16x128xf32>
    %5 = tpu.matmul %3, %4, %cst_5 {dimension_numbers = #tpu.dot_dimension_numbers<[1], [0], [0], [1], [0, 0, 1, 1], [], []>} : vector<16x16xbf16>, vector<16x128xbf16>, vector<16x128xf32> -> vector<16x128xf32>
    %c0_6 = arith.constant 0 : index
    %c0_7 = arith.constant 0 : index
    %6 = vector.load %arg3[%c0_6, %c0_7] : memref<1x128xf32, #tpu.memory_space<vmem>>, vector<1x128xf32>
    %7 = vector.broadcast %6 : vector<1x128xf32> to vector<16x128xf32>
    %8 = arith.addf %5, %7 : vector<16x128xf32>
    %cst_8 = arith.constant 0.000000e+00 : f32
    %9 = vector.broadcast %cst_8 : f32 to vector<16x128xf32>
    %10 = arith.maximumf %8, %9 : vector<16x128xf32>
    %c0_9 = arith.constant 0 : index
    %c0_10 = arith.constant 0 : index
    %11 = vector.load %arg6[%c0_9, %c0_10] : memref<16x128xf32, #tpu.memory_space<vmem>>, vector<16x128xf32>
    %cst_11 = arith.constant 8.000000e-01 : f32
    %12 = vector.broadcast %cst_11 : f32 to vector<16x128xf32>
    %13 = arith.cmpf olt, %11, %12 : vector<16x128xf32>
    %cst_12 = arith.constant 1.250000e+00 : f32
    %14 = vector.broadcast %cst_12 : f32 to vector<16x128xf32>
    %15 = arith.mulf %10, %14 : vector<16x128xf32>
    %cst_13 = arith.constant 0.000000e+00 : f32
    %16 = vector.broadcast %cst_13 : f32 to vector<16x128xf32>
    %17 = arith.select %13, %15, %16 : vector<16x128xi1>, vector<16x128xf32>
    %18 = arith.truncf %17 : vector<16x128xf32> to vector<16x128xbf16>
    %c0_14 = arith.constant 0 : index
    %c0_15 = arith.constant 0 : index
    %19 = vector.load %arg4[%c0_14, %c0_15] : memref<128x128xbf16, #tpu.memory_space<vmem>>, vector<128x128xbf16>
    %cst_16 = arith.constant dense<0.000000e+00> : vector<16x128xf32>
    %20 = tpu.matmul %18, %19, %cst_16 {dimension_numbers = #tpu.dot_dimension_numbers<[1], [0], [0], [1], [0, 0, 1, 1], [], []>} : vector<16x128xbf16>, vector<128x128xbf16>, vector<16x128xf32> -> vector<16x128xf32>
    %c0_17 = arith.constant 0 : index
    %c0_18 = arith.constant 0 : index
    %21 = vector.load %arg0[%c0_17, %c0_18] : memref<16x16xbf16, #tpu.memory_space<vmem>>, vector<16x16xbf16>
    %22 = arith.truncf %20 : vector<16x128xf32> to vector<16x128xbf16>
    %cst_19 = arith.constant dense<0.000000e+00> : vector<16x128xf32>
    %23 = tpu.matmul %21, %22, %cst_19 {dimension_numbers = #tpu.dot_dimension_numbers<[1], [0], [0], [1], [0, 0, 1, 1], [], []>} : vector<16x16xbf16>, vector<16x128xbf16>, vector<16x128xf32> -> vector<16x128xf32>
    %c0_20 = arith.constant 0 : index
    %c0_21 = arith.constant 0 : index
    %24 = vector.load %arg5[%c0_20, %c0_21] : memref<1x128xf32, #tpu.memory_space<vmem>>, vector<1x128xf32>
    %25 = vector.broadcast %24 : vector<1x128xf32> to vector<16x128xf32>
    %26 = arith.addf %23, %25 : vector<16x128xf32>
    %27 = tpu.iota {dimensions = array<i32: 1>} : vector<16x128xi32>
    %c2_i32 = arith.constant 2 : i32
    %28 = vector.broadcast %c2_i32 : i32 to vector<16x128xi32>
    %29 = arith.cmpi slt, %27, %28 : vector<16x128xi32>
    %cst_22 = arith.constant 0xFF800000 : f32
    %30 = vector.broadcast %cst_22 : f32 to vector<16x128xf32>
    %31 = arith.select %29, %26, %30 : vector<16x128xi1>, vector<16x128xf32>
    %cst_23 = arith.constant dense<0xFF800000> : vector<16xf32>
    %32 = vector.multi_reduction <maximumf>, %31, %cst_23 [1] : vector<16x128xf32> to vector<16xf32>
    %33 = vector.shape_cast %32 : vector<16xf32> to vector<16x1xf32>
    %34 = vector.broadcast %33 : vector<16x1xf32> to vector<16x128xf32>
    %35 = arith.subf %31, %34 : vector<16x128xf32>
    %36 = math.exp %35 : vector<16x128xf32>
    %cst_24 = arith.constant dense<0.000000e+00> : vector<16xf32>
    %37 = vector.multi_reduction <add>, %36, %cst_24 [1] : vector<16x128xf32> to vector<16xf32>
    %38 = vector.shape_cast %37 : vector<16xf32> to vector<16x1xf32>
    %39 = math.log %38 : vector<16x1xf32>
    %40 = arith.addf %39, %33 : vector<16x1xf32>
    %41 = vector.broadcast %40 : vector<16x1xf32> to vector<16x128xf32>
    %42 = arith.subf %31, %41 : vector<16x128xf32>
    %c0_25 = arith.constant 0 : index
    %c0_26 = arith.constant 0 : index
    %43 = vector.load %arg7[%c0_25, %c0_26] : memref<16x128xf32, #tpu.memory_space<vmem>>, vector<16x128xf32>
    tpu.vector_store %arg7[%c0_25, %c0_26], %42 {strides = array<i32>} : memref<16x128xf32, #tpu.memory_space<vmem>>, vector<16x128xf32>,
    return
  }
}

</mosaic_0001>

<bundles_post_ra>
// kernel: tpu_custom_call.1
= control target key start
LH: loop header
LB: loop body
LE: loop exit
PB: predicated region body
PF: predicated region fallthrough
CT: control target
= control target key end

     0   :  { %12 = vsyncpa [#allocation3], 0  ;;  %s869_s0 = inlined_call_operand.hbm [shape: bf16[16,16], index: 0, kind: input, shape index: {}]   ;;  %s870_s1 = inlined_call_operand.hbm [shape: bf16[16,128], index: 1, kind: input, shape index: {}]   ;;  %s871_s2 = inlined_call_operand.hbm [shape: bf16[128,128], index: 2, kind: input, shape index: {}]   ;;  %s872_s3 = inlined_call_operand.vmem [shape: f32[1,128], index: 3, kind: input, shape index: {}]   ;;  %s873_s4 = inlined_call_operand.hbm [shape: bf16[128,128], index: 4, kind: input, shape index: {}]   ;;  %s874_s5 = inlined_call_operand.vmem [shape: f32[1,128], index: 5, kind: input, shape index: {}]   ;;  %s875_s6 = inlined_call_operand.hbm [shape: f32[16,128], index: 6, kind: input, shape index: {}]   ;;  %s876_s7 = inlined_call_operand.hbm [shape: f32[16,128], index: 7, kind: output, shape index: {}]  }
   0x1   :  { %13 = vsyncpa [#allocation6], 0 }
   0x2   :  { %14 = vsyncpa [#allocation9], 0 }
   0x3   :  { %15 = vsyncpa [#allocation4], 0  ;;  %s747_s24 = smov [#allocation5]   ;;  %s748_s26 = smov [#allocation8]  }
   0x4   :  { %s33_s25 = sshll.u32 %s747_s24, 4  ;;  %s59_s27 = sshll.u32 %s748_s26, 4  ;;  %s34_s25 = int_to_ptr.vmem [resolvable:$true] %s33_s25  ;;  %s60_s27 = int_to_ptr.vmem [resolvable:$true] %s59_s27 }
   0x5   :  { %s627_s28 = scalar_lea.vmem %s34_s25, 128  ;;  %p632_p1 = scmp.lt.s32.totalorder %s34_s25, %s34_s25 }
   0x6   :  { %p628_p0 = scmp.ne.s32.totalorder %s34_s25, %s627_s28  ;;  %p633_p2 = scmp.lt.s32.totalorder %s627_s28, %s627_s28 }
   0x8   :  { %p634_p3 = por %p633_p2, %p632_p1 }
   0xa   :  { %p635_p4 = pnand %p634_p3, %p628_p0 }
   0xc   :  { %638 = shalt.err (!%p635_p4)
}
   0xd   :  { %s749_s29 = smov 64   ;;  %s750_s30 = smov 4  }
   0xe   :  { %39 = dma.hbm_to_vmem [thread:$0]  %s870_s1, 128, %s34_s25, [#allocation6], %s749_s29, %s749_s29, %s750_s30  }
   0xf   :  { %s647_s10 = scalar_lea.vmem %s60_s27, 1024  ;;  %p652_p6 = scmp.lt.s32.totalorder %s60_s27, %s60_s27 }
  0x10   :  { %p648_p5 = scmp.ne.s32.totalorder %s60_s27, %s647_s10  ;;  %p653_p7 = scmp.lt.s32.totalorder %s647_s10, %s647_s10 }
  0x12   :  { %p654_p8 = por %p653_p7, %p652_p6 }
  0x14   :  { %p655_p9 = pnand %p654_p8, %p648_p5 }
  0x16   :  { %658 = shalt.err (!%p655_p9)
}
  0x17   :  { %65 = dma.hbm_to_vmem [thread:$0]  %s873_s4, 1024, %s60_s27, [#allocation9], %s749_s29, %s749_s29, %s750_s30  }
  0x18   :  { %s751_s13 = smov [#allocation2]   ;;  %s752_s15 = smov [#allocation7]  }
  0x19   :  { %s21_s14 = sshll.u32 %s751_s13, 4  ;;  %s45_s16 = sshll.u32 %s752_s15, 4  ;;  %s22_s14 = int_to_ptr.vmem [resolvable:$true] %s21_s14  ;;  %s46_s16 = int_to_ptr.vmem [resolvable:$true] %s45_s16 }
  0x1a   :  { %s667_s1 = scalar_lea.vmem %s22_s14, 128  ;;  %p672_p11 = scmp.lt.s32.totalorder %s22_s14, %s22_s14 }
  0x1b   :  { %p668_p10 = scmp.ne.s32.totalorder %s22_s14, %s667_s1  ;;  %p673_p12 = scmp.lt.s32.totalorder %s667_s1, %s667_s1 }
  0x1d   :  { %p674_p13 = por %p673_p12, %p672_p11 }
  0x1f   :  { %p675_p0 = pnand %p674_p13, %p668_p10 }
  0x21   :  { %678 = shalt.err (!%p675_p0)
}
  0x22   :  { %27 = dma.hbm_to_vmem [thread:$0]  %s869_s0, 128, %s22_s14, [#allocation3], %s749_s29, %s749_s29, %s750_s30  }
  0x23   :  { %s687_s4 = scalar_lea.vmem %s46_s16, 1024  ;;  %p692_p2 = scmp.lt.s32.totalorder %s46_s16, %s46_s16 }
  0x24   :  { %p688_p1 = scmp.ne.s32.totalorder %s46_s16, %s687_s4  ;;  %p693_p3 = scmp.lt.s32.totalorder %s687_s4, %s687_s4 }
  0x26   :  { %p694_p4 = por %p693_p3, %p692_p2 }
  0x28   :  { %p695_p5 = pnand %p694_p4, %p688_p1 }
  0x2a   :  { %698 = shalt.err (!%p695_p5)
}
  0x2b   :  { %51 = dma.hbm_to_vmem [thread:$0]  %s871_s2, 1024, %s46_s16, [#allocation6], %s749_s29, %s749_s29, %s750_s30  }
  0x2c   :  { %s753_s21 = smov [#allocation10]  }
  0x2d   :  { %s73_s22 = sshll.u32 %s753_s21, 4  ;;  %s74_s22 = int_to_ptr.vmem [resolvable:$true] %s73_s22 }
  0x2e   :  { %s707_s23 = scalar_lea.vmem %s74_s22, 256  ;;  %p712_p7 = scmp.lt.s32.totalorder %s74_s22, %s74_s22 }
  0x2f   :  { %p708_p6 = scmp.ne.s32.totalorder %s74_s22, %s707_s23  ;;  %p713_p8 = scmp.lt.s32.totalorder %s707_s23, %s707_s23 }
  0x31   :  { %p714_p9 = por %p713_p8, %p712_p7 }
  0x33   :  { %p715_p10 = pnand %p714_p9, %p708_p6 }
  0x35   :  { %718 = shalt.err (!%p715_p10)
}
  0x36   :  { %s754_s0 = smov 128   ;;  %s755_s24 = smov 8  }
  0x37   :  { %79 = dma.hbm_to_vmem [thread:$0]  %s875_s6, 256, %s74_s22, [#allocation9], %s754_s0, %s754_s0, %s755_s24  }
  0x38   :  { %739 = dma.done.wait [#allocation3], 128  }
  0x39   :  { %740 = vsyncadd [#allocation3], 4294967168 }
  0x3a   :  { %741 = dma.done.wait [#allocation6], 1152  }
  0x3b   :  { %742 = vsyncadd [#allocation6], 4294966144 }
  0x3c   :  { %743 = dma.done.wait [#allocation9], 1280  }
  0x3d   :  { %744 = vsyncadd [#allocation9], 4294966016  ;;  %v756_v0 = vmov 0.0   ;;  %vm757_vm0 = vmmov 0   ;;  %v593_v1 = vld [vmem:[#allocation7 + $0x38] sm:$0xff]   ;;  %v594_v2 = vld [vmem:[#allocation7 + $0x30] sm:$0xff]   ;;  %v434_v43 = vlaneseq }
  0x3e   :  { %529 = vmatprep.subr.bf16.mxu0 %v756_v0  ;;  %545 = vmatprep.mubr.msk.bf16.mxu0 %vm757_vm0, %v756_v0  ;;  %v595_v3 = vld [vmem:[#allocation7 + $0x28] sm:$0xff]   ;;  %v596_v4 = vld [vmem:[#allocation7 + $0x20] sm:$0xff]   ;;  %v597_v5 = vld [vmem:[#allocation7 + $0x18] sm:$0xff]   ;;  %vm224_vm1 = vcmask 130048  }
  0x3f   :  { %549 = vmatprep.subr.bf16.mxu1 %v756_v0  ;;  %551 = vmatprep.mubr.msk.bf16.mxu1 %vm757_vm0, %v756_v0  ;;  %v598_v6 = vld [vmem:[#allocation7 + $0x10] sm:$0xff]   ;;  %v599_v7 = vld [vmem:[#allocation7 + $0x8] sm:$0xff]   ;;  %v600_v8 = vld [vmem:[#allocation7] sm:$0xff]   ;;  %v435_v44 = vand.u32 127, %v434_v43 }
  0x40   :  { %530 = vmatpush3.bf16.msra.mxu0 %v593_v1  ;;  %v601_v9 = vld [vmem:[#allocation5] sm:$0xff]   ;;  %v602_v15 = vld [vmem:[#allocation2] sm:$0xff]   ;;  %v605_v18 = vld [vmem:[#allocation8 + $0x28] sm:$0xff]  }
  0x41   :  { %531 = vmatprep.subr.bf16.mxu0 %v756_v0  ;;  %v603_v16 = vld [vmem:[#allocation8 + $0x38] sm:$0xff]   ;;  %v604_v17 = vld [vmem:[#allocation8 + $0x30] sm:$0xff]   ;;  %v606_v19 = vld [vmem:[#allocation8 + $0x20] sm:$0xff]   ;;  %vm436_vm5 = vcmp.lt.s32.totalorder %v435_v44, 2 }
  0x42   :  { %v607_v20 = vld [vmem:[#allocation8 + $0x18] sm:$0xff]   ;;  %v608_v21 = vld [vmem:[#allocation8 + $0x10] sm:$0xff]   ;;  %v609_v22 = vld [vmem:[#allocation8 + $0x8] sm:$0xff]  }
  0x43   :  { %v610_v23 = vld [vmem:[#allocation8] sm:$0xff]   ;;  %v491_v24 = vld [vmem:[%s872_s3] ss:$0 sm:$0xff]  ;;  %v272_v30 = vld [vmem:[#allocation10 + $0x8] sm:$0xff] }
  0x44   :  { %532 = vmatpush3.bf16.msra.mxu0 %v594_v2  ;;  %v271_v29 = vld [vmem:[#allocation10] sm:$0xff]  ;;  %vm274_vm3 = vcmp.lt.f32.partialorder %v272_v30, 0.8  ;;  %v505_v45 = vld [vmem:[%s874_s5] ss:$0 sm:$0xff]  ;;  %s758_s5 = smov [#allocation11]  }
  0x45   :  { %533 = vmatprep.subr.bf16.mxu0 %v756_v0  ;;  %vm273_vm2 = vcmp.lt.f32.partialorder %v271_v29, 0.8  ;;  %s468_s28 = sshll.u32 %s758_s5, 4  ;;  %s469_s28 = int_to_ptr.vmem [resolvable:$true] %s468_s28 }
  0x46   :  { %vm502_vm4 = vmpackc.low %vm274_vm3, %vm273_vm2  ;;  %s719_s29 = scalar_lea.vmem %s469_s28, 256  ;;  %p724_p12 = scmp.lt.s32.totalorder %s469_s28, %s469_s28 }
  0x47   :  { %p720_p11 = scmp.ne.s32.totalorder %s469_s28, %s719_s29  ;;  %p725_p13 = scmp.lt.s32.totalorder %s719_s29, %s719_s29 }
  0x48   :  { %534 = vmatpush3.bf16.msra.mxu0 %v595_v3 }
  0x49   :  { %535 = vmatprep.subr.bf16.mxu0 %v756_v0  ;;  %p726_p0 = por %p725_p13, %p724_p12 }
  0x4b   :  { %p727_p1 = pnand %p726_p0, %p720_p11 }
  0x4c   :  { %536 = vmatpush3.bf16.msra.mxu0 %v596_v4 }
  0x4d   :  { %537 = vmatprep.subr.bf16.mxu0 %v756_v0 }
  0x50   :  { %538 = vmatpush3.bf16.msra.mxu0 %v597_v5 }
  0x51   :  { %539 = vmatprep.subr.bf16.mxu0 %v756_v0 }
  0x54   :  { %540 = vmatpush3.bf16.msra.mxu0 %v598_v6 }
  0x55   :  { %541 = vmatprep.subr.bf16.mxu0 %v756_v0 }
  0x58   :  { %542 = vmatpush3.bf16.msra.mxu0 %v599_v7 }
  0x59   :  { %543 = vmatprep.subr.bf16.mxu0 %v756_v0 }
  0x5c   :  { %544 = vmatpush3.bf16.msra.mxu0 %v600_v8 }
  0x5d   :  { %575 = vmatprep.subr.bf16.mxu0 %v756_v0 }
  0x5f   :  { %546 = vmatmul.mubr.bf16.vlgmr.msra.gmra.mxu0 %v601_v9 }
  0x60   :  { %577 = vmatprep.mubr.msk.bf16.mxu0 %vm757_vm0, %v756_v0 }
 0x11f   :  { %v202_v10 = vpop.f32.mrf.mxu0 }
 0x121   :  { %v547_v11 = vpop.f32.mrf.mxu0 }
 0x123   :  { %v205_v12 = vpop.f32.mrf.mxu0 }
 0x124   :  { %v211_v13 = vpack.c.bf16 %v205_v12, %v202_v10 }
 0x125   :  { %v548_v14 = vpop.f32.mrf.mxu0 }
 0x126   :  { %550 = vmatpush3.bf16.msra.mxu1 %v211_v13 }
 0x127   :  { %555 = vmatprep.subr.bf16.mxu1 %v756_v0 }
 0x129   :  { %552 = vmatmul.mubr.msk.bf16.vlgmr.msra.gmra.mxu1 %vm224_vm1, %v602_v15 }
 0x12a   :  { %556 = vmatpush3.bf16.msra.mxu1 %v603_v16  ;;  %571 = vmatprep.mubr.msk.bf16.mxu1 %vm757_vm0, %v756_v0 }
 0x12b   :  { %557 = vmatprep.subr.bf16.mxu1 %v756_v0 }
 0x12e   :  { %558 = vmatpush3.bf16.msra.mxu1 %v604_v17 }
 0x12f   :  { %559 = vmatprep.subr.bf16.mxu1 %v756_v0 }
 0x132   :  { %560 = vmatpush3.bf16.msra.mxu1 %v605_v18 }
 0x133   :  { %561 = vmatprep.subr.bf16.mxu1 %v756_v0 }
 0x136   :  { %562 = vmatpush3.bf16.msra.mxu1 %v606_v19 }
 0x137   :  { %563 = vmatprep.subr.bf16.mxu1 %v756_v0 }
 0x13a   :  { %564 = vmatpush3.bf16.msra.mxu1 %v607_v20 }
 0x13b   :  { %565 = vmatprep.subr.bf16.mxu1 %v756_v0 }
 0x13e   :  { %566 = vmatpush3.bf16.msra.mxu1 %v608_v21 }
 0x13f   :  { %567 = vmatprep.subr.bf16.mxu1 %v756_v0 }
 0x142   :  { %568 = vmatpush3.bf16.msra.mxu1 %v609_v22 }
 0x143   :  { %569 = vmatprep.subr.bf16.mxu1 %v756_v0 }
 0x146   :  { %570 = vmatpush3.bf16.msra.mxu1 %v610_v23 }
 0x1e9   :  { %v262_v25 = vpop.f32.mrf.mxu1 }
 0x1ea   :  { %v263_v26 = vadd.f32 %v491_v24, %v262_v25 }
 0x1eb   :  { %v553_v27 = vpop.f32.mrf.mxu1 }
 0x1ec   :  { %v269_v31 = vmax.f32 %v263_v26, 0.0 }
 0x1ed   :  { %v265_v28 = vpop.f32.mrf.mxu1 }
 0x1ee   :  { %v266_v32 = vadd.f32 %v491_v24, %v265_v28  ;;  %v275_v35 = vmul.f32 1.25, %v269_v31 }
 0x1ef   :  { %v554_v33 = vpop.f32.mrf.mxu1 }
 0x1f0   :  { %v270_v34 = vmax.f32 %v266_v32, 0.0 }
 0x1f2   :  { %v276_v36 = vmul.f32 1.25, %v270_v34 }
 0x1f4   :  { %v503_v37 = vpack.c.bf16 %v276_v36, %v275_v35 }
 0x1f6   :  { %572 = vmatmul.mubr.msk.bf16.vlgmr.msra.gmra.mxu1 %vm502_vm4, %v503_v37 }
 0x2b6   :  { %v378_v38 = vpop.f32.mrf.mxu1 }
 0x2b8   :  { %v573_v39 = vpop.f32.mrf.mxu1 }
 0x2ba   :  { %v381_v40 = vpop.f32.mrf.mxu1 }
 0x2bb   :  { %v385_v41 = vpack.c.bf16 %v381_v40, %v378_v38 }
 0x2bc   :  { %v574_v42 = vpop.f32.mrf.mxu1 }
 0x2bd   :  { %576 = vmatpush3.bf16.msra.mxu0 %v385_v41 }
 0x2c0   :  { %578 = vmatmul.mubr.msk.bf16.vlgmr.msra.gmra.mxu0 %vm224_vm1, %v602_v15 }
 0x380   :  { %v427_v46 = vpop.f32.mrf.mxu0 }
 0x381   :  { %v428_v47 = vadd.f32 %v505_v45, %v427_v46 }
 0x382   :  { %v579_v48 = vpop.f32.mrf.mxu0 }
 0x383   :  { %v437_v49 = vsel %vm436_vm5, %v428_v47, -inf }
 0x384   :  { %439 = vmax.xlane.f32.xlu0 %v437_v49  ;;  %v430_v50 = vpop.f32.mrf.mxu0 }
 0x385   :  { %v431_v51 = vadd.f32 %v505_v45, %v430_v50 }
 0x386   :  { %v580_v52 = vpop.f32.mrf.mxu0 }
 0x387   :  { %v438_v53 = vsel %vm436_vm5, %v431_v51, -inf }
 0x388   :  { %441 = vmax.xlane.f32.xlu0 %v438_v53 }
 0x40d   :  { %v440_v54 = vpop.xlane.xlu0 %439 }
 0x40e   :  { %v443_v55 = vsub.f32 %v437_v49, %v440_v54 }
 0x410   :  { %v445_v56 = vmul.f32 1.442695, %v443_v55 }
 0x411   :  { %v442_v57 = vpop.xlane.xlu0 %441 }
 0x412   :  { %611 = vpow2.f32 %v445_v56  ;;  %v444_v58 = vsub.f32 %v438_v53, %v442_v57 }
 0x414   :  { %v447_v59 = vmul.f32 1.442695, %v444_v58 }
 0x416   :  { %613 = vpow2.f32 %v447_v59 }
 0x41f   :  { %v612_v60 = vpop.eup %611 }
 0x420   :  { %449 = vadd.xlane.f32.xlu1 %v612_v60 }
 0x423   :  { %v614_v61 = vpop.eup %613 }
 0x424   :  { %451 = vadd.xlane.f32.xlu1 %v614_v61 }
 0x4a9   :  { %v450_v62 = vpop.xlane.xlu1 %449 }
 0x4aa   :  { %615 = vlog2.f32 %v450_v62 }
 0x4ad   :  { %v452_v63 = vpop.xlane.xlu1 %451 }
 0x4ae   :  { %617 = vlog2.f32 %v452_v63 }
 0x4b7   :  { %v616_v0 = vpop.eup %615 }
 0x4b8   :  { %v454_v1 = vmul.f32 0.6931472, %v616_v0 }
 0x4ba   :  { %v457_v2 = vadd.f32 %v454_v1, %v440_v54 }
 0x4bb   :  { %v618_v3 = vpop.eup %617 }
 0x4bc   :  { %v456_v4 = vmul.f32 0.6931472, %v618_v3  ;;  %v459_v5 = vsub.f32 %v437_v49, %v457_v2 }
 0x4be   :  { %v458_v6 = vadd.f32 %v456_v4, %v442_v57  ;;  %461 = vst [vmem:[#allocation11] sm:$0xff] %v459_v5 }
 0x4c0   :  { %v460_v7 = vsub.f32 %v438_v53, %v458_v6 }
 0x4c2   :  { %462 = vst [vmem:[#allocation11 + $0x8] sm:$0xff] %v460_v7 }
 0x4c3   :  { %730 = shalt.err (!%p727_p1)
}
 0x4c4   :  { %474 = dma.vmem_to_hbm [thread:$0]  %s469_s28, 256, %s876_s7, [#allocation4], %s754_s0, %s754_s0, %s755_s24  }
 0x4c5   :  { %745 = dma.done.wait [#allocation4], 256  }
 0x4c6   :  { %746 = vsyncadd [#allocation4], 4294967040 }
 0x4c7   :  { %478 = vsyncpa [#allocation3], 1 }
 0x4c8   :  { %479 = vsyncpa [#allocation6], 1 }
 0x4c9   :  { %480 = vsyncpa [#allocation9], 1 }
 0x4ca   :  { %481 = vsyncpa [#allocation4], 1 }

</bundles_post_ra>
